<compile_context>
chip_gen: v7x
topology: tpu7x:2x2x1
jax: 0.10.0
libtpu: 0.0.40
codegen_flags: <defaults>
</compile_context>

<pallas_src>
import functools

import jax
import jax.numpy as jnp
from jax.experimental import pallas as pl
from jax.experimental.pallas import tpu as pltpu


def _pos_embed_dma_kernel(table_hbm, out_hbm, sem, *, chunks):
    """Copy table[:seq_len, :] (as static row chunks) HBM -> HBM via async DMA."""
    copies = []
    for idx, (start, rows) in enumerate(chunks):
        cp = pltpu.make_async_copy(
            table_hbm.at[pl.ds(start, rows), :],
            out_hbm.at[pl.ds(start, rows), :],
            sem.at[idx],
        )
        cp.start()
        copies.append(cp)
    for cp in copies:
        cp.wait()


def position_embedding(x: jax.Array, table: jax.Array) -> jax.Array:
    """Equivalent of PositionEmbedding.forward: returns table[:x.shape[1], :]."""
    seq_len = int(x.shape[1])
    max_len, d_model = table.shape
    assert seq_len <= max_len, "sequence length exceeds max_len of the embedding table"

    itemsize = jnp.dtype(table.dtype).itemsize
    total_bytes = seq_len * d_model * itemsize

    # Row-chunk the copy only when large: each chunk ~8 MiB, at most 4 chunks in flight.
    target_chunk_bytes = 8 * 1024 * 1024
    n_chunks = max(1, min(4, pl.cdiv(total_bytes, target_chunk_bytes)))
    # Keep chunk starts aligned to the dtype's sublane pack (8 f32 / 16 bf16 / 32 int8).
    sublane = {4: 8, 2: 16, 1: 32}.get(itemsize, 8)
    rows_per_chunk = pl.cdiv(seq_len, n_chunks)
    rows_per_chunk = pl.cdiv(rows_per_chunk, sublane) * sublane

    chunks = []
    start = 0
    while start < seq_len:
        rows = min(rows_per_chunk, seq_len - start)
        chunks.append((start, rows))
        start += rows
    n_chunks = len(chunks)

    return pl.pallas_call(
        functools.partial(_pos_embed_dma_kernel, chunks=tuple(chunks)),
        out_shape=jax.ShapeDtypeStruct((seq_len, d_model), table.dtype),
        in_specs=[pl.BlockSpec(memory_space=pl.ANY)],   # table stays in HBM, no auto-DMA
        out_specs=pl.BlockSpec(memory_space=pl.ANY),    # output written directly by DMA
        scratch_shapes=[pltpu.SemaphoreType.DMA((n_chunks,))],
        cost_estimate=pl.CostEstimate(
            flops=0, transcendentals=0, bytes_accessed=2 * total_bytes),
    )(table)


if __name__ == "__main__":
    key = jax.random.PRNGKey(0)
    k_tab, k_x = jax.random.split(key)

    batch, seq_len, d_model, max_len = 2, 16, 128, 64

    # nn.Embedding(max_len, d_model) default init: weight ~ N(0, 1), float32.
    table = jax.random.normal(k_tab, (max_len, d_model), dtype=jnp.float32)
    # x is only used for its sequence length (dim 1), same as the PyTorch forward.
    x = jax.random.normal(k_x, (batch, seq_len, d_model), dtype=jnp.float32)

    out = position_embedding(x, table)
    out = jax.block_until_ready(out)

    # Reference check against plain JAX semantics of the PyTorch module.
    ref = table[jnp.arange(seq_len)]
    assert out.shape == (seq_len, d_model)
    assert out.dtype == jnp.float32
    assert jnp.allclose(out, ref)

    print("KERNEL_OK")
</pallas_src>

<mosaic_0001>
module attributes {stable_mosaic.version = 11 : i64} {
  func.func @_pos_embed_dma_kernel(%arg0: memref<64x128xf32, #tpu.memory_space<any>>, %arg1: memref<16x128xf32, #tpu.memory_space<any>>, %arg2: memref<1x!tpu.dma_semaphore, #tpu.memory_space<semaphore_mem>>) attributes {dimension_semantics = [], scalar_prefetch = 0 : i64, scratch_operands = 1 : i64, tpu.core_type = #tpu.core_type<tc>} {
    %c0_i32 = arith.constant 0 : i32
    %c0_i32_0 = arith.constant 0 : i32
    %c0_i32_1 = arith.constant 0 : i32
    %0 = tpu.memref_slice %arg0[%c0_i32_0, %c0_i32_1] : memref<64x128xf32, #tpu.memory_space<any>> -> memref<16x128xf32, #tpu.memory_space<any>>
    %c0_i32_2 = arith.constant 0 : i32
    %c0_i32_3 = arith.constant 0 : i32
    %1 = tpu.memref_slice %arg1[%c0_i32_2, %c0_i32_3] : memref<16x128xf32, #tpu.memory_space<any>> -> memref<16x128xf32, #tpu.memory_space<any>>
    %2 = tpu.memref_slice %arg2[%c0_i32] : memref<1x!tpu.dma_semaphore, #tpu.memory_space<semaphore_mem>> -> memref<1x!tpu.dma_semaphore, #tpu.memory_space<semaphore_mem>>
    %3 = tpu.memref_squeeze %2 : memref<1x!tpu.dma_semaphore, #tpu.memory_space<semaphore_mem>> -> memref<!tpu.dma_semaphore, #tpu.memory_space<semaphore_mem>>
    tpu.enqueue_dma source(%0 : memref<16x128xf32, #tpu.memory_space<any>>) target(%1 : memref<16x128xf32, #tpu.memory_space<any>>) target_semaphore(%3 : memref<!tpu.dma_semaphore, #tpu.memory_space<semaphore_mem>>)
    %c0_i32_4 = arith.constant 0 : i32
    %c0_i32_5 = arith.constant 0 : i32
    %c0_i32_6 = arith.constant 0 : i32
    %4 = tpu.memref_slice %arg0[%c0_i32_5, %c0_i32_6] : memref<64x128xf32, #tpu.memory_space<any>> -> memref<16x128xf32, #tpu.memory_space<any>>
    %c0_i32_7 = arith.constant 0 : i32
    %c0_i32_8 = arith.constant 0 : i32
    %5 = tpu.memref_slice %arg1[%c0_i32_7, %c0_i32_8] : memref<16x128xf32, #tpu.memory_space<any>> -> memref<16x128xf32, #tpu.memory_space<any>>
    %6 = tpu.memref_slice %arg2[%c0_i32_4] : memref<1x!tpu.dma_semaphore, #tpu.memory_space<semaphore_mem>> -> memref<1x!tpu.dma_semaphore, #tpu.memory_space<semaphore_mem>>
    %7 = tpu.memref_squeeze %6 : memref<1x!tpu.dma_semaphore, #tpu.memory_space<semaphore_mem>> -> memref<!tpu.dma_semaphore, #tpu.memory_space<semaphore_mem>>
    tpu.wait_dma2 semaphore(%7 : memref<!tpu.dma_semaphore, #tpu.memory_space<semaphore_mem>>) src(%4 : memref<16x128xf32, #tpu.memory_space<any>>) dst(%5 : memref<16x128xf32, #tpu.memory_space<any>>)
    return
  }
}

</mosaic_0001>

<bundles_post_ra>
// kernel: tpu_custom_call.1
= control target key start
LH: loop header
LB: loop body
LE: loop exit
PB: predicated region body
PF: predicated region fallthrough
CT: control target
= control target key end

     0   :  { %s34_s6 = smov [#allocation2]   ;;  %s35_s7 = smov [#allocation3]   ;;  %s53_s0 = inlined_call_operand.hbm [shape: f32[64,128], index: 0, kind: input, shape index: {}]   ;;  %s54_s1 = inlined_call_operand.hbm [shape: f32[16,128], index: 1, kind: output, shape index: {}]  }
   0x1   :  { %s36_s8 = smov 0  }
   0x2   :  { %18 = dma.general %s53_s0, 256, %s54_s1, %s34_s6, %s35_s7, [#allocation4], %s36_s8, 0  }
   0x3   :  { %32 = dma.done.wait [#allocation2], 256 }
   0x4   :  { %33 = vsyncadd [#allocation2], 4294967040 }
   0x5   :  { %22 = vsyncmov [#allocation2] }
   0x8   :  { %s23_s13 = vpop.sfrf %22 }
   0x9   :  { %p28_p0 = scmp.ne.s32.totalorder %s23_s13, 0 }
   0xb   :  { %27 = shalt.err (%p28_p0)  }

</bundles_post_ra>
